<compile_context>
chip_gen: v5e
topology: v5e:2x2
jax: 0.10.0
libtpu: 0.0.40
codegen_flags: <defaults>
</compile_context>

<pallas_src>
import functools
import math

import jax
import jax.numpy as jnp
import numpy as np
from jax import lax
from jax.experimental import pallas as pl
from jax.experimental.pallas import tpu as pltpu


def _stats_kernel(x_ref, c_ref, inv_allsum_ref,
                  w1_ref, b1_ref, gm_ref, be_ref, w2_ref, b2_ref,
                  y_ref, k_ref,
                  sumx_acc, m_acc, *, num_features):
    """Streams x once; accumulates sum(x) and M = g^T g; finalizes y and k."""
    f32 = jnp.float32
    t = pl.program_id(0)
    nt = pl.num_programs(0)

    @pl.when(t == 0)
    def _init():
        sumx_acc[...] = jnp.zeros_like(sumx_acc)
        m_acc[...] = jnp.zeros_like(m_acc)

    x = x_ref[...].astype(f32)                       # [TN, F]
    c = c_ref[...].astype(f32)                       # [TN, 1]  (exact, from wrapper)

    # Weighted mean:  avg = att^T normx = sum(x, axis=0) / allsum
    sumx_acc[...] += jnp.sum(x, axis=0, keepdims=True)

    # Second moment on the MXU:  M += g^T @ g,  g = sqrt(att) * normx = x * c
    g = x * c                                        # [TN, F]
    m_acc[...] += lax.dot_general(
        g, g, (((0,), (0,)), ((), ())), preferred_element_type=f32)

    @pl.when(t == nt - 1)
    def _finalize():
        inv_allsum = inv_allsum_ref[...].astype(f32)         # [1, 1], exact
        avg = sumx_acc[...] * inv_allsum                      # [1, F]

        # ---- tiny MLP head (runs exactly once per call) ----
        y = jnp.dot(avg, w1_ref[...].astype(f32),
                    preferred_element_type=f32) + b1_ref[...].astype(f32)
        y = jnp.maximum(y, 0.0)                               # relu
        mu = jnp.mean(y, axis=-1, keepdims=True)
        var = jnp.mean((y - mu) ** 2, axis=-1, keepdims=True)
        y = (y - mu) * lax.rsqrt(var + 1e-5) * gm_ref[...].astype(f32) \
            + be_ref[...].astype(f32)                         # layernorm
        y = jnp.dot(y, w2_ref[...].astype(f32),
                    preferred_element_type=f32) + b2_ref[...].astype(f32)
        y = 1.0 / (1.0 + jnp.exp(-y))                         # sigmoid (one-shot)
        y = 0.25 + y * 2.0                                    # [1, F]
        y_ref[...] = y.astype(y_ref.dtype)

        # ---- covariance statistics from cov = M - avg^T avg ----
        m = m_acc[...]                                        # [F, F]
        nf = jnp.asarray(num_features, f32)
        qq = jnp.sum(y * y)

        ri = lax.broadcasted_iota(jnp.int32, m.shape, 0)
        ci = lax.broadcasted_iota(jnp.int32, m.shape, 1)
        diag_m = jnp.sum(jnp.where(ri == ci, m, 0.0),
                         axis=0, keepdims=True)               # [1, F] = diag(M)
        diag_cov = diag_m - avg * avg                         # [1, F]

        ym = jnp.dot(y, m, preferred_element_type=f32)        # [1, F] = y @ M
        q_cov_q = jnp.sum(ym * y) - jnp.sum(avg * y) ** 2     # sum(ls)
        sumdiag = jnp.sum(diag_cov * y * y)                   # trace-weighted
        trace_cov = jnp.sum(diag_cov)
        sum_cov = jnp.sum(m) - jnp.sum(avg) ** 2

        loss = sumdiag - (q_cov_q - sumdiag) / nf
        lscov = trace_cov - (sum_cov - trace_cov) / nf
        k = loss / lscov * nf / qq
        # TODO(synk): the eval-mode `print(k)` side effect of the PyTorch
        # module is intentionally omitted.
        k_ref[...] = k * jnp.ones((1, 1), f32)


def _scale_kernel(x_ref, y_ref, out_ref):
    """xout = x * y, embarrassingly parallel over row tiles."""
    out_ref[...] = (x_ref[...].astype(jnp.float32) *
                    y_ref[...].astype(jnp.float32)).astype(out_ref.dtype)


def _pick_block_rows(n, f, vmem_budget_bytes=8 << 20):
    """Row tile from a VMEM budget (double-buffered in/out f32 tiles)."""
    rows = max(8, min(n, 2048, vmem_budget_bytes // (6 * f * 4)))
    rows -= rows % 8
    if rows <= 0:
        return n
    while rows > 8 and n % rows != 0:
        rows -= 8
    return rows if (rows > 0 and n % rows == 0) else n


def rep_forward(x, adj, params, *, block_rows=None):
    """x: [N, F] float32, adj: [N, N] dense float32. Returns (x*y [N,F], k scalar)."""
    n, f = x.shape
    w1t, b1, gamma, beta, w2t, b2 = params

    if block_rows is None:
        block_rows = _pick_block_rows(n, f)
    assert n % block_rows == 0, "row tile must divide N"
    assert block_rows == n or block_rows % 8 == 0, "row tile must be a multiple of 8"
    nt = n // block_rows

    # Only the column sums of adj are ever used -> keep the O(N^2) adjacency
    # out of the kernel entirely; all reciprocals are exact (done here, in XLA).
    sumlines = jnp.sum(adj, axis=0, dtype=jnp.float32).reshape(n, 1)
    allsum = jnp.sum(sumlines, dtype=jnp.float32)
    inv_allsum = (1.0 / allsum).reshape(1, 1)
    row_scale = (1.0 / jnp.sqrt(sumlines * allsum)).astype(jnp.float32)  # [N,1]

    def inv(shape):  # grid-invariant operand (block index pinned at origin)
        nd = len(shape)
        return pl.BlockSpec(shape, lambda t, _nd=nd: (0,) * _nd)

    # ---- kernel 1: sequential streaming reduction (avg, M) + MLP + k ----
    y, k = pl.pallas_call(
        functools.partial(_stats_kernel, num_features=f),
        out_shape=(jax.ShapeDtypeStruct((1, f), jnp.float32),   # y
                   jax.ShapeDtypeStruct((1, 1), jnp.float32)),  # k
        grid=(nt,),
        in_specs=[
            pl.BlockSpec((block_rows, f), lambda t: (t, 0)),    # x (streamed)
            pl.BlockSpec((block_rows, 1), lambda t: (t, 0)),    # 1/sqrt(sl*allsum)
            inv((1, 1)),                                        # 1/allsum
            inv(w1t.shape), inv(b1.shape), inv(gamma.shape),
            inv(beta.shape), inv(w2t.shape), inv(b2.shape),
        ],
        out_specs=(inv((1, f)), inv((1, 1))),
        scratch_shapes=[
            pltpu.VMEM((1, f), jnp.float32),   # sum(x) accumulator
            pltpu.VMEM((f, f), jnp.float32),   # second-moment M accumulator (MXU)
        ],
        compiler_params=pltpu.CompilerParams(
            dimension_semantics=("arbitrary",)),   # carries accumulator state
    )(x, row_scale, inv_allsum, w1t, b1, gamma, beta, w2t, b2)

    # ---- kernel 2: xout = x * y (pure HBM streaming, parallel row tiles) ----
    xout = pl.pallas_call(
        _scale_kernel,
        out_shape=jax.ShapeDtypeStruct((n, f), x.dtype),
        grid=(nt,),
        in_specs=[pl.BlockSpec((block_rows, f), lambda t: (t, 0)),
                  pl.BlockSpec((1, f), lambda t: (0, 0))],
        out_specs=pl.BlockSpec((block_rows, f), lambda t: (t, 0)),
        compiler_params=pltpu.CompilerParams(
            dimension_semantics=("parallel",)),     # both TCs on v7x
    )(x, y)

    return xout, k[0, 0]


def rep_reference(x, adj, params, num_features):
    """Pure-JAX reference mirroring the PyTorch forward exactly."""
    w1t, b1, g, be, w2t, b2 = params
    sumlines = jnp.sum(adj, axis=0)[:, None]
    allsum = jnp.sum(sumlines)
    att = sumlines / allsum
    normx = x / sumlines
    avg = att.T @ normx
    y = jnp.maximum(avg @ w1t + b1, 0.0)
    mu = y.mean(-1, keepdims=True)
    var = ((y - mu) ** 2).mean(-1, keepdims=True)
    y = (y - mu) / jnp.sqrt(var + 1e-5) * g + be
    y = jax.nn.sigmoid(y @ w2t + b2)
    y = 0.25 + y * 2.0
    dimmin = jnp.sqrt(att) * (normx - avg)
    cov = dimmin.T @ dimmin
    q = y[0]
    qq = jnp.sum(q * q)
    ls = (cov * q).T * q
    sumdiag = jnp.sum(jnp.diag(ls))
    loss = sumdiag - (jnp.sum(ls) - sumdiag) / num_features
    sdc = jnp.sum(jnp.diag(cov))
    lscov = sdc - (jnp.sum(cov) - sdc) / num_features
    k = loss / lscov * num_features / qq
    return x * y, k


if __name__ == "__main__":
    # Small but lane-dense shapes: 128 graph nodes, 128 features (mid == F).
    N, F = 128, 128

    key = jax.random.PRNGKey(0)
    kx, ka, k1, k2, k3, k4 = jax.random.split(key, 6)

    x = jax.random.normal(kx, (N, F), dtype=jnp.float32)
    # dense "adjacency": positive entries so column sums are nonzero
    adj = jax.random.uniform(ka, (N, N), jnp.float32, minval=0.1, maxval=1.0)

    bound = 1.0 / math.sqrt(F)
    # weights stored pre-transposed as [in, out]
    w1t = jax.random.uniform(k1, (F, F), jnp.float32, -bound, bound)
    b1 = jax.random.uniform(k2, (1, F), jnp.float32, -bound, bound)
    gamma = jnp.ones((1, F), jnp.float32)
    beta = jnp.zeros((1, F), jnp.float32)
    w2t = jax.random.uniform(k3, (F, F), jnp.float32, -bound, bound)
    b2 = jax.random.uniform(k4, (1, F), jnp.float32, -bound, bound)
    params = (w1t, b1, gamma, beta, w2t, b2)

    # 4 row tiles -> exercises the accumulator / finalize paths.
    xout, kval = rep_forward(x, adj, params, block_rows=32)
    xout = jax.block_until_ready(xout)
    kval = jax.block_until_ready(kval)

    xref, kref = rep_reference(x, adj, params, F)
    np.testing.assert_allclose(np.asarray(xout), np.asarray(xref),
                               rtol=2e-3, atol=1e-4)
    np.testing.assert_allclose(float(kval), float(kref), rtol=1e-2, atol=1e-4)

    print("KERNEL_OK")
</pallas_src>

<mosaic_0001>
module attributes {stable_mosaic.version = 11 : i64} {
  func.func @_stats_kernel(%arg0: i32, %arg1: memref<32x128xf32, #tpu.memory_space<vmem>>, %arg2: memref<32x1xf32, #tpu.memory_space<vmem>>, %arg3: memref<1x1xf32, #tpu.memory_space<vmem>>, %arg4: memref<128x128xf32, #tpu.memory_space<vmem>>, %arg5: memref<1x128xf32, #tpu.memory_space<vmem>>, %arg6: memref<1x128xf32, #tpu.memory_space<vmem>>, %arg7: memref<1x128xf32, #tpu.memory_space<vmem>>, %arg8: memref<128x128xf32, #tpu.memory_space<vmem>>, %arg9: memref<1x128xf32, #tpu.memory_space<vmem>>, %arg10: memref<1x128xf32, #tpu.memory_space<vmem>>, %arg11: memref<1x1xf32, #tpu.memory_space<vmem>>, %arg12: memref<1x128xf32, #tpu.memory_space<vmem>>, %arg13: memref<128x128xf32, #tpu.memory_space<vmem>>) attributes {dimension_semantics = [#tpu.dimension_semantics<arbitrary>], iteration_bounds = array<i64: 4>, scalar_prefetch = 0 : i64, scratch_operands = 2 : i64, tpu.core_type = #tpu.core_type<tc>, window_params = [{transform_indices = @transform_0, window_bounds = array<i64: 32, 128>}, {transform_indices = @transform_1, window_bounds = array<i64: 32, 1>}, {pipeline_mode = #tpu.pipeline_mode<synchronous>, transform_indices = @transform_2, window_bounds = array<i64: 1, 1>}, {pipeline_mode = #tpu.pipeline_mode<synchronous>, transform_indices = @transform_3, window_bounds = array<i64: 128, 128>}, {pipeline_mode = #tpu.pipeline_mode<synchronous>, transform_indices = @transform_4, window_bounds = array<i64: 1, 128>}, {pipeline_mode = #tpu.pipeline_mode<synchronous>, transform_indices = @transform_5, window_bounds = array<i64: 1, 128>}, {pipeline_mode = #tpu.pipeline_mode<synchronous>, transform_indices = @transform_6, window_bounds = array<i64: 1, 128>}, {pipeline_mode = #tpu.pipeline_mode<synchronous>, transform_indices = @transform_7, window_bounds = array<i64: 128, 128>}, {pipeline_mode = #tpu.pipeline_mode<synchronous>, transform_indices = @transform_8, window_bounds = array<i64: 1, 128>}, {pipeline_mode = #tpu.pipeline_mode<synchronous>, transform_indices = @transform_9, window_bounds = array<i64: 1, 128>}, {pipeline_mode = #tpu.pipeline_mode<synchronous>, transform_indices = @transform_10, window_bounds = array<i64: 1, 1>}]} {
    %c0_i32 = arith.constant 0 : i32
    %0 = arith.cmpi eq, %arg0, %c0_i32 : i32
    %1 = arith.extui %0 : i1 to i32
    %c0_i32_0 = arith.constant 0 : i32
    %2 = arith.cmpi ne, %1, %c0_i32_0 : i32
    scf.if %2 {
      %cst_14 = arith.constant 0.000000e+00 : f32
      %19 = vector.broadcast %cst_14 : f32 to vector<1x128xf32>
      %c0_15 = arith.constant 0 : index
      %c0_16 = arith.constant 0 : index
      %20 = vector.load %arg12[%c0_15, %c0_16] : memref<1x128xf32, #tpu.memory_space<vmem>>, vector<1x128xf32>
      tpu.vector_store %arg12[%c0_15, %c0_16], %19 {strides = array<i32>} : memref<1x128xf32, #tpu.memory_space<vmem>>, vector<1x128xf32>,
      %cst_17 = arith.constant 0.000000e+00 : f32
      %21 = vector.broadcast %cst_17 : f32 to vector<128x128xf32>
      %c0_18 = arith.constant 0 : index
      %c0_19 = arith.constant 0 : index
      %22 = vector.load %arg13[%c0_18, %c0_19] : memref<128x128xf32, #tpu.memory_space<vmem>>, vector<128x128xf32>
      tpu.vector_store %arg13[%c0_18, %c0_19], %21 {strides = array<i32>} : memref<128x128xf32, #tpu.memory_space<vmem>>, vector<128x128xf32>,
    } else {
    }
    %c0 = arith.constant 0 : index
    %c0_1 = arith.constant 0 : index
    %3 = vector.load %arg1[%c0, %c0_1] : memref<32x128xf32, #tpu.memory_space<vmem>>, vector<32x128xf32>
    %c0_2 = arith.constant 0 : index
    %c0_3 = arith.constant 0 : index
    %4 = vector.load %arg2[%c0_2, %c0_3] : memref<32x1xf32, #tpu.memory_space<vmem>>, vector<32x1xf32>
    %c0_4 = arith.constant 0 : index
    %c0_5 = arith.constant 0 : index
    %5 = vector.load %arg12[%c0_4, %c0_5] : memref<1x128xf32, #tpu.memory_space<vmem>>, vector<1x128xf32>
    %cst = arith.constant dense<0.000000e+00> : vector<128xf32>
    %6 = vector.multi_reduction <add>, %3, %cst [0] : vector<32x128xf32> to vector<128xf32>
    %7 = vector.shape_cast %6 : vector<128xf32> to vector<1x128xf32>
    %8 = arith.addf %5, %7 : vector<1x128xf32>
    %c0_6 = arith.constant 0 : index
    %c0_7 = arith.constant 0 : index
    %9 = vector.load %arg12[%c0_6, %c0_7] : memref<1x128xf32, #tpu.memory_space<vmem>>, vector<1x128xf32>
    tpu.vector_store %arg12[%c0_6, %c0_7], %8 {strides = array<i32>} : memref<1x128xf32, #tpu.memory_space<vmem>>, vector<1x128xf32>,
    %10 = vector.broadcast %4 : vector<32x1xf32> to vector<32x128xf32>
    %11 = arith.mulf %3, %10 : vector<32x128xf32>
    %c0_8 = arith.constant 0 : index
    %c0_9 = arith.constant 0 : index
    %12 = vector.load %arg13[%c0_8, %c0_9] : memref<128x128xf32, #tpu.memory_space<vmem>>, vector<128x128xf32>
    %cst_10 = arith.constant dense<0.000000e+00> : vector<128x128xf32>
    %13 = tpu.matmul %11, %11, %cst_10 {dimension_numbers = #tpu.dot_dimension_numbers<[0], [0], [1], [1], [0, 1, 1, 1], [], []>} : vector<32x128xf32>, vector<32x128xf32>, vector<128x128xf32> -> vector<128x128xf32>
    %14 = arith.addf %12, %13 : vector<128x128xf32>
    %c0_11 = arith.constant 0 : index
    %c0_12 = arith.constant 0 : index
    %15 = vector.load %arg13[%c0_11, %c0_12] : memref<128x128xf32, #tpu.memory_space<vmem>>, vector<128x128xf32>
    tpu.vector_store %arg13[%c0_11, %c0_12], %14 {strides = array<i32>} : memref<128x128xf32, #tpu.memory_space<vmem>>, vector<128x128xf32>,
    %c3_i32 = arith.constant 3 : i32
    %16 = arith.cmpi eq, %arg0, %c3_i32 : i32
    %17 = arith.extui %16 : i1 to i32
    %c0_i32_13 = arith.constant 0 : i32
    %18 = arith.cmpi ne, %17, %c0_i32_13 : i32
    scf.if %18 {
      %c0_14 = arith.constant 0 : index
      %c0_15 = arith.constant 0 : index
      %19 = vector.load %arg3[%c0_14, %c0_15] : memref<1x1xf32, #tpu.memory_space<vmem>>, vector<1x1xf32>
      %c0_16 = arith.constant 0 : index
      %c0_17 = arith.constant 0 : index
      %20 = vector.load %arg12[%c0_16, %c0_17] : memref<1x128xf32, #tpu.memory_space<vmem>>, vector<1x128xf32>
      %21 = vector.broadcast %19 : vector<1x1xf32> to vector<1x128xf32>
      %22 = arith.mulf %20, %21 : vector<1x128xf32>
      %c0_18 = arith.constant 0 : index
      %c0_19 = arith.constant 0 : index
      %23 = vector.load %arg4[%c0_18, %c0_19] : memref<128x128xf32, #tpu.memory_space<vmem>>, vector<128x128xf32>
      %cst_20 = arith.constant dense<0.000000e+00> : vector<1x128xf32>
      %24 = tpu.matmul %22, %23, %cst_20 {dimension_numbers = #tpu.dot_dimension_numbers<[1], [0], [0], [1], [0, 0, 1, 1], [], []>} : vector<1x128xf32>, vector<128x128xf32>, vector<1x128xf32> -> vector<1x128xf32>
      %c0_21 = arith.constant 0 : index
      %c0_22 = arith.constant 0 : index
      %25 = vector.load %arg5[%c0_21, %c0_22] : memref<1x128xf32, #tpu.memory_space<vmem>>, vector<1x128xf32>
      %26 = arith.addf %24, %25 : vector<1x128xf32>
      %cst_23 = arith.constant 0.000000e+00 : f32
      %27 = vector.broadcast %cst_23 : f32 to vector<1x128xf32>
      %28 = arith.maximumf %26, %27 : vector<1x128xf32>
      %cst_24 = arith.constant dense<0.000000e+00> : vector<1xf32>
      %29 = vector.multi_reduction <add>, %28, %cst_24 [1] : vector<1x128xf32> to vector<1xf32>
      %30 = vector.shape_cast %29 : vector<1xf32> to vector<1x1xf32>
      %cst_25 = arith.constant 1.280000e+02 : f32
      %31 = vector.broadcast %cst_25 : f32 to vector<1x1xf32>
      %32 = arith.divf %30, %31 : vector<1x1xf32>
      %33 = vector.broadcast %32 : vector<1x1xf32> to vector<1x128xf32>
      %34 = arith.subf %28, %33 : vector<1x128xf32>
      %35 = arith.mulf %34, %34 : vector<1x128xf32>
      %cst_26 = arith.constant dense<0.000000e+00> : vector<1xf32>
      %36 = vector.multi_reduction <add>, %35, %cst_26 [1] : vector<1x128xf32> to vector<1xf32>
      %37 = vector.shape_cast %36 : vector<1xf32> to vector<1x1xf32>
      %cst_27 = arith.constant 1.280000e+02 : f32
      %38 = vector.broadcast %cst_27 : f32 to vector<1x1xf32>
      %39 = arith.divf %37, %38 : vector<1x1xf32>
      %40 = vector.broadcast %32 : vector<1x1xf32> to vector<1x128xf32>
      %41 = arith.subf %28, %40 : vector<1x128xf32>
      %cst_28 = arith.constant 9.99999974E-6 : f32
      %42 = vector.broadcast %cst_28 : f32 to vector<1x1xf32>
      %43 = arith.addf %39, %42 : vector<1x1xf32>
      %44 = math.rsqrt %43 : vector<1x1xf32>
      %45 = vector.broadcast %44 : vector<1x1xf32> to vector<1x128xf32>
      %46 = arith.mulf %41, %45 : vector<1x128xf32>
      %c0_29 = arith.constant 0 : index
      %c0_30 = arith.constant 0 : index
      %47 = vector.load %arg6[%c0_29, %c0_30] : memref<1x128xf32, #tpu.memory_space<vmem>>, vector<1x128xf32>
      %48 = arith.mulf %46, %47 : vector<1x128xf32>
      %c0_31 = arith.constant 0 : index
      %c0_32 = arith.constant 0 : index
      %49 = vector.load %arg7[%c0_31, %c0_32] : memref<1x128xf32, #tpu.memory_space<vmem>>, vector<1x128xf32>
      %50 = arith.addf %48, %49 : vector<1x128xf32>
      %c0_33 = arith.constant 0 : index
      %c0_34 = arith.constant 0 : index
      %51 = vector.load %arg8[%c0_33, %c0_34] : memref<128x128xf32, #tpu.memory_space<vmem>>, vector<128x128xf32>
      %cst_35 = arith.constant dense<0.000000e+00> : vector<1x128xf32>
      %52 = tpu.matmul %50, %51, %cst_35 {dimension_numbers = #tpu.dot_dimension_numbers<[1], [0], [0], [1], [0, 0, 1, 1], [], []>} : vector<1x128xf32>, vector<128x128xf32>, vector<1x128xf32> -> vector<1x128xf32>
      %c0_36 = arith.constant 0 : index
      %c0_37 = arith.constant 0 : index
      %53 = vector.load %arg9[%c0_36, %c0_37] : memref<1x128xf32, #tpu.memory_space<vmem>>, vector<1x128xf32>
      %54 = arith.addf %52, %53 : vector<1x128xf32>
      %cst_38 = arith.constant 0.000000e+00 : f32
      %55 = vector.broadcast %cst_38 : f32 to vector<1x128xf32>
      %56 = arith.subf %55, %54 : vector<1x128xf32>
      %57 = math.exp %56 : vector<1x128xf32>
      %cst_39 = arith.constant 1.000000e+00 : f32
      %58 = vector.broadcast %cst_39 : f32 to vector<1x128xf32>
      %59 = arith.addf %58, %57 : vector<1x128xf32>
      %cst_40 = arith.constant 1.000000e+00 : f32
      %60 = vector.broadcast %cst_40 : f32 to vector<1x128xf32>
      %61 = arith.divf %60, %59 : vector<1x128xf32>
      %cst_41 = arith.constant 2.000000e+00 : f32
      %62 = vector.broadcast %cst_41 : f32 to vector<1x128xf32>
      %63 = arith.mulf %61, %62 : vector<1x128xf32>
      %cst_42 = arith.constant 2.500000e-01 : f32
      %64 = vector.broadcast %cst_42 : f32 to vector<1x128xf32>
      %65 = arith.addf %64, %63 : vector<1x128xf32>
      %c0_43 = arith.constant 0 : index
      %c0_44 = arith.constant 0 : index
      %66 = vector.load %arg10[%c0_43, %c0_44] : memref<1x128xf32, #tpu.memory_space<vmem>>, vector<1x128xf32>
      tpu.vector_store %arg10[%c0_43, %c0_44], %65 {strides = array<i32>} : memref<1x128xf32, #tpu.memory_space<vmem>>, vector<1x128xf32>,
      %c0_45 = arith.constant 0 : index
      %c0_46 = arith.constant 0 : index
      %67 = vector.load %arg13[%c0_45, %c0_46] : memref<128x128xf32, #tpu.memory_space<vmem>>, vector<128x128xf32>
      %68 = arith.mulf %65, %65 : vector<1x128xf32>
      %69 = vector.shape_cast %68 : vector<1x128xf32> to vector<1x1x128xf32>
      %cst_47 = arith.constant dense<0.000000e+00> : vector<1xf32>
      %70 = vector.multi_reduction <add>, %69, %cst_47 [1, 2] : vector<1x1x128xf32> to vector<1xf32>
      %71 = vector.shape_cast %70 : vector<1xf32> to vector<1x1x1xf32>
      %72 = vector.extract %71[0, 0, 0] : f32 from vector<1x1x1xf32>
      %73 = tpu.iota {dimensions = array<i32: 0>} : vector<128x128xi32>
      %74 = tpu.iota {dimensions = array<i32: 1>} : vector<128x128xi32>
      %75 = arith.cmpi eq, %73, %74 : vector<128x128xi32>
      %cst_48 = arith.constant 0.000000e+00 : f32
      %76 = vector.broadcast %cst_48 : f32 to vector<128x128xf32>
      %77 = arith.select %75, %67, %76 : vector<128x128xi1>, vector<128x128xf32>
      %cst_49 = arith.constant dense<0.000000e+00> : vector<128xf32>
      %78 = vector.multi_reduction <add>, %77, %cst_49 [0] : vector<128x128xf32> to vector<128xf32>
      %79 = vector.shape_cast %78 : vector<128xf32> to vector<1x128xf32>
      %80 = arith.mulf %22, %22 : vector<1x128xf32>
      %81 = arith.subf %79, %80 : vector<1x128xf32>
      %cst_50 = arith.constant dense<0.000000e+00> : vector<1x128xf32>
      %82 = tpu.matmul %65, %67, %cst_50 {dimension_numbers = #tpu.dot_dimension_numbers<[1], [0], [0], [1], [0, 0, 1, 1], [], []>} : vector<1x128xf32>, vector<128x128xf32>, vector<1x128xf32> -> vector<1x128xf32>
      %83 = arith.mulf %82, %65 : vector<1x128xf32>
      %84 = vector.shape_cast %83 : vector<1x128xf32> to vector<1x1x128xf32>
      %cst_51 = arith.constant dense<0.000000e+00> : vector<1xf32>
      %85 = vector.multi_reduction <add>, %84, %cst_51 [1, 2] : vector<1x1x128xf32> to vector<1xf32>
      %86 = vector.shape_cast %85 : vector<1xf32> to vector<1x1x1xf32>
      %87 = vector.extract %86[0, 0, 0] : f32 from vector<1x1x1xf32>
      %88 = arith.mulf %22, %65 : vector<1x128xf32>
      %89 = vector.shape_cast %88 : vector<1x128xf32> to vector<1x1x128xf32>
      %cst_52 = arith.constant dense<0.000000e+00> : vector<1xf32>
      %90 = vector.multi_reduction <add>, %89, %cst_52 [1, 2] : vector<1x1x128xf32> to vector<1xf32>
      %91 = vector.shape_cast %90 : vector<1xf32> to vector<1x1x1xf32>
      %92 = vector.extract %91[0, 0, 0] : f32 from vector<1x1x1xf32>
      %93 = arith.mulf %92, %92 : f32
      %94 = arith.subf %87, %93 : f32
      %95 = arith.mulf %81, %65 : vector<1x128xf32>
      %96 = arith.mulf %95, %65 : vector<1x128xf32>
      %97 = vector.shape_cast %96 : vector<1x128xf32> to vector<1x1x128xf32>
      %cst_53 = arith.constant dense<0.000000e+00> : vector<1xf32>
      %98 = vector.multi_reduction <add>, %97, %cst_53 [1, 2] : vector<1x1x128xf32> to vector<1xf32>
      %99 = vector.shape_cast %98 : vector<1xf32> to vector<1x1x1xf32>
      %100 = vector.extract %99[0, 0, 0] : f32 from vector<1x1x1xf32>
      %101 = vector.shape_cast %81 : vector<1x128xf32> to vector<1x1x128xf32>
      %cst_54 = arith.constant dense<0.000000e+00> : vector<1xf32>
      %102 = vector.multi_reduction <add>, %101, %cst_54 [1, 2] : vector<1x1x128xf32> to vector<1xf32>
      %103 = vector.shape_cast %102 : vector<1xf32> to vector<1x1x1xf32>
      %104 = vector.extract %103[0, 0, 0] : f32 from vector<1x1x1xf32>
      %105 = vector.shape_cast %67 : vector<128x128xf32> to vector<1x128x128xf32>
      %cst_55 = arith.constant dense<0.000000e+00> : vector<1xf32>
      %106 = vector.multi_reduction <add>, %105, %cst_55 [1, 2] : vector<1x128x128xf32> to vector<1xf32>
      %107 = vector.shape_cast %106 : vector<1xf32> to vector<1x1x1xf32>
      %108 = vector.extract %107[0, 0, 0] : f32 from vector<1x1x1xf32>
      %109 = vector.shape_cast %22 : vector<1x128xf32> to vector<1x1x128xf32>
      %cst_56 = arith.constant dense<0.000000e+00> : vector<1xf32>
      %110 = vector.multi_reduction <add>, %109, %cst_56 [1, 2] : vector<1x1x128xf32> to vector<1xf32>
      %111 = vector.shape_cast %110 : vector<1xf32> to vector<1x1x1xf32>
      %112 = vector.extract %111[0, 0, 0] : f32 from vector<1x1x1xf32>
      %113 = arith.mulf %112, %112 : f32
      %114 = arith.subf %108, %113 : f32
      %115 = arith.subf %94, %100 : f32
      %cst_57 = arith.constant 1.280000e+02 : f32
      %116 = arith.divf %115, %cst_57 : f32
      %117 = arith.subf %100, %116 : f32
      %118 = arith.subf %114, %104 : f32
      %cst_58 = arith.constant 1.280000e+02 : f32
      %119 = arith.divf %118, %cst_58 : f32
      %120 = arith.subf %104, %119 : f32
      %121 = arith.divf %117, %120 : f32
      %cst_59 = arith.constant 1.280000e+02 : f32
      %122 = arith.mulf %121, %cst_59 : f32
      %123 = arith.divf %122, %72 : f32
      %cst_60 = arith.constant 1.000000e+00 : f32
      %124 = vector.broadcast %cst_60 : f32 to vector<1x1xf32>
      %125 = vector.broadcast %123 : f32 to vector<1x1xf32>
      %126 = arith.mulf %125, %124 : vector<1x1xf32>
      %c0_61 = arith.constant 0 : index
      %c0_62 = arith.constant 0 : index
      %127 = vector.load %arg11[%c0_61, %c0_62] : memref<1x1xf32, #tpu.memory_space<vmem>>, vector<1x1xf32>
      tpu.vector_store %arg11[%c0_61, %c0_62], %126 {strides = array<i32>} : memref<1x1xf32, #tpu.memory_space<vmem>>, vector<1x1xf32>,
    } else {
    }
    return
  }
  func.func @transform_0(%arg0: i32) -> (i32, i32) {
    %c0_i32 = arith.constant 0 : i32
    %c0_i32_0 = arith.constant 0 : i32
    return %arg0, %c0_i32 : i32, i32
  }
  func.func @transform_1(%arg0: i32) -> (i32, i32) {
    %c0_i32 = arith.constant 0 : i32
    %c0_i32_0 = arith.constant 0 : i32
    return %arg0, %c0_i32 : i32, i32
  }
  func.func @transform_2(%arg0: i32) -> (i32, i32) {
    %c0_i32 = arith.constant 0 : i32
    %c0_i32_0 = arith.constant 0 : i32
    %c0_i32_1 = arith.constant 0 : i32
    return %c0_i32, %c0_i32_0 : i32, i32
  }
  func.func @transform_3(%arg0: i32) -> (i32, i32) {
    %c0_i32 = arith.constant 0 : i32
    %c0_i32_0 = arith.constant 0 : i32
    %c0_i32_1 = arith.constant 0 : i32
    return %c0_i32, %c0_i32_0 : i32, i32
  }
  func.func @transform_4(%arg0: i32) -> (i32, i32) {
    %c0_i32 = arith.constant 0 : i32
    %c0_i32_0 = arith.constant 0 : i32
    %c0_i32_1 = arith.constant 0 : i32
    return %c0_i32, %c0_i32_0 : i32, i32
  }
  func.func @transform_5(%arg0: i32) -> (i32, i32) {
    %c0_i32 = arith.constant 0 : i32
    %c0_i32_0 = arith.constant 0 : i32
    %c0_i32_1 = arith.constant 0 : i32
    return %c0_i32, %c0_i32_0 : i32, i32
  }
  func.func @transform_6(%arg0: i32) -> (i32, i32) {
    %c0_i32 = arith.constant 0 : i32
    %c0_i32_0 = arith.constant 0 : i32
    %c0_i32_1 = arith.constant 0 : i32
    return %c0_i32, %c0_i32_0 : i32, i32
  }
  func.func @transform_7(%arg0: i32) -> (i32, i32) {
    %c0_i32 = arith.constant 0 : i32
    %c0_i32_0 = arith.constant 0 : i32
    %c0_i32_1 = arith.constant 0 : i32
    return %c0_i32, %c0_i32_0 : i32, i32
  }
  func.func @transform_8(%arg0: i32) -> (i32, i32) {
    %c0_i32 = arith.constant 0 : i32
    %c0_i32_0 = arith.constant 0 : i32
    %c0_i32_1 = arith.constant 0 : i32
    return %c0_i32, %c0_i32_0 : i32, i32
  }
  func.func @transform_9(%arg0: i32) -> (i32, i32) {
    %c0_i32 = arith.constant 0 : i32
    %c0_i32_0 = arith.constant 0 : i32
    %c0_i32_1 = arith.constant 0 : i32
    return %c0_i32, %c0_i32_0 : i32, i32
  }
  func.func @transform_10(%arg0: i32) -> (i32, i32) {
    %c0_i32 = arith.constant 0 : i32
    %c0_i32_0 = arith.constant 0 : i32
    %c0_i32_1 = arith.constant 0 : i32
    return %c0_i32, %c0_i32_0 : i32, i32
  }
}

</mosaic_0001>

<bundles_post_ra>
// kernel: tpu_custom_call.1
= control target key start
LH: loop header
LB: loop body
LE: loop exit
PB: predicated region body
PF: predicated region fallthrough
CT: control target
= control target key end

     0   :  { %s1770_s0 = inlined_call_operand.vmem [shape: f32[128,128], index: 0, kind: input, shape index: {}]   ;;  %s1771_s1 = inlined_call_operand.vmem [shape: f32[128,1], index: 1, kind: input, shape index: {}]   ;;  %s1772_s2 = inlined_call_operand.<no memory space> [shape: f32[1,1], index: 2, kind: input, shape index: {}]   ;;  %s1773_s3 = inlined_call_operand.hbm [shape: f32[128,128], index: 3, kind: input, shape index: {}]   ;;  %s1774_s4 = inlined_call_operand.vmem [shape: f32[1,128], index: 4, kind: input, shape index: {}]   ;;  %s1775_s5 = inlined_call_operand.vmem [shape: f32[1,128], index: 5, kind: input, shape index: {}]   ;;  %s1776_s6 = inlined_call_operand.vmem [shape: f32[1,128], index: 6, kind: input, shape index: {}]   ;;  %s1777_s7 = inlined_call_operand.hbm [shape: f32[128,128], index: 7, kind: input, shape index: {}]   ;;  %s1778_s8 = inlined_call_operand.vmem [shape: f32[1,128], index: 8, kind: input, shape index: {}]   ;;  %s1779_s9 = inlined_call_operand.hbm [shape: f32[1,128], index: 9, kind: output, shape index: {0}]   ;;  %s1780_s10 = inlined_call_operand.hbm [shape: f32[1,1], index: 10, kind: output, shape index: {1}]  }
   0x1   :  { %v16_v0 = vstv %s1772_s2 }
   0x2   :  { %17 = vst [vmem:[#allocation4] sm:$0x1] %v16_v0 }
   0x3   :  { %18 = vsyncpa [#allocation6], 0 }
   0x4   :  { %19 = vsyncpa [#allocation9], 0 }
   0x5   :  { %20 = vsyncpa [#allocation7], 0 }
   0x6   :  { %21 = vsyncpa [#allocation12], 0  ;;  %s1518_s15 = smov 0  }
   0x7 LB: > { %s287_s18 = sshll.u32 %s1773_s3, 4  ;;  %s1527_s2 = sadd.s32 4294967295, %s1448_s15   ;;  %s1448_s15 = sphi %s1518_s15, %s27_s15   ;;  %s288_s18 = int_to_ptr.hbm [resolvable:$true] %s287_s18 }
   0x8   : > { %p1178_p0 = scmp.ge.s32.totalorder %s1448_s15, 1  ;;  %p273_p1 = scmp.lt.s32.totalorder %s1448_s15, 5 }
   0x9   : > { %p1179_p2 = scmp.ne.s32.totalorder %s1527_s2, 0  ;;  %p1268_p3 = scmp.eq.s32.totalorder %s1527_s2, 0 }
   0xa   : > { %p1533_p4 = pnand %p1178_p0, %p273_p1  ;;  %s1450_s20 = smov [#allocation5]  }
   0xb   : > { %s289_s21 = sshll.u32 %s1450_s20, 4  ;;  %s310_s24 = sshll.u32 %s1777_s7, 4  ;;  %s290_s21 = int_to_ptr.vmem [resolvable:$true] %s289_s21  ;;  %s311_s24 = int_to_ptr.hbm [resolvable:$true] %s310_s24 }
   0xc   : > { %p1261_p5 = pneg %p1533_p4  ;;  %s1451_s25 = smov [#allocation8]  }
   0xd   : > { %s312_s26 = sshll.u32 %s1451_s25, 4  ;;  %s1452_s27 = smov 128   ;;  %s313_s26 = int_to_ptr.vmem [resolvable:$true] %s312_s26 }
   0xe   : > { %p1262_p6 = pnand %p1268_p3, %p1261_p5  ;;  %s1453_s28 = smov 8  }
   0xf   : > { %349 = sbr.rel (%p1533_p4) target bundleno = 1675 (0x68b), region = 56 }
  0x10   : > { %1264 = dma.hbm_to_vmem [thread:$0]  (!%p1262_p6), %s288_s18, 2048, %s290_s21, [#allocation6], %s1452_s27, %s1452_s27, %s1453_s28  }
  0x11   : > { %1267 = dma.hbm_to_vmem [thread:$0]  (!%p1262_p6), %s311_s24, 2048, %s313_s26, [#allocation9], %s1452_s27, %s1452_s27, %s1453_s28  }
  0x14   : > { %1431 = dma.done.wait (%p1268_p3), [#allocation6], 2048  }
  0x15   : > { %1433 = vsyncadd (%p1268_p3), [#allocation6], 4294965248 }
  0x16   : > { %1435 = dma.done.wait (%p1268_p3), [#allocation9], 2048  }
  0x17   : > { %1437 = vsyncadd (%p1268_p3), [#allocation9], 4294965248  ;;  %s1185_s29 = sshll.u32 %s1527_s2, 2 }
  0x18   : > { %p394_p7 = scmp.lt.s32.totalorder %s1185_s29, 15  ;;  %408 = sbr.rel (%p1179_p2) target bundleno = 47 (0x2f), region = 68 }
  0x1a   : > { %s1783_s29 = smov (!%p394_p7, %s1185_s29), 15 }
  0x1b   : > { %s1186_s30 = sshll.u32 %s1783_s29, 3 }
  0x1c   : > { %s1558_s13 = scalar_lea.vmem %s1770_s0, %s1186_s30  ;;  %s403_s17 = scalar_lea.vmem %s1771_s1, %s1186_s30 }
  0x1d   : > { %v1454_v1 = vmov 0.0  }
  0x1e   : > { %409 = vst [vmem:[#allocation2] sm:$0x1] %v1454_v1 }
  0x1f   : > { %410 = vst [vmem:[#allocation3 + $0x30] sm:$0xff] %v1454_v1 }
  0x20   : > { %411 = vst [vmem:[#allocation3] sm:$0xff] %v1454_v1 }
  0x21   : > { %412 = vst [vmem:[#allocation3 + $0x58] sm:$0xff] %v1454_v1 }
  0x22   : > { %413 = vst [vmem:[#allocation3 + $0x18] sm:$0xff] %v1454_v1 }
  0x23   : > { %414 = vst [vmem:[#allocation3 + $0x50] sm:$0xff] %v1454_v1 }
  0x24   : > { %415 = vst [vmem:[#allocation3 + $0x68] sm:$0xff] %v1454_v1 }
  0x25   : > { %416 = vst [vmem:[#allocation3 + $0x8] sm:$0xff] %v1454_v1 }
  0x26   : > { %417 = vst [vmem:[#allocation3 + $0x48] sm:$0xff] %v1454_v1 }
  0x27   : > { %418 = vst [vmem:[#allocation3 + $0x40] sm:$0xff] %v1454_v1 }
  0x28   : > { %419 = vst [vmem:[#allocation3 + $0x20] sm:$0xff] %v1454_v1 }
  0x29   : > { %420 = vst [vmem:[#allocation3 + $0x10] sm:$0xff] %v1454_v1 }
  0x2a   : > { %421 = vst [vmem:[#allocation3 + $0x38] sm:$0xff] %v1454_v1 }
  0x2b   : > { %422 = vst [vmem:[#allocation3 + $0x60] sm:$0xff] %v1454_v1 }
  0x2c   : > { %423 = vst [vmem:[#allocation3 + $0x70] sm:$0xff] %v1454_v1 }
  0x2d   : > { %424 = vst [vmem:[#allocation3 + $0x78] sm:$0xff] %v1454_v1 }
  0x2e   : > { %425 = vst [vmem:[#allocation3 + $0x28] sm:$0xff] %v1454_v1 }
  0x2f PF: > { %v432_v2 = vld [vmem:[%s403_s17 + $0x10] sm:$0xff]  ;;  %v430_v3 = vld [vmem:[%s403_s17] sm:$0xff]  ;;  %v1455_v4 = vmov 0   ;;  %v433_v5 = vld [vmem:[%s403_s17 + $0x18] sm:$0xff]  ;;  %vm518_vm0 = vcmask 261120   ;;  %p1206_p8 = scmp.ne.s32.totalorder %s1527_s2, 3 }
  0x30   : > { %1296 = vset.pattern.permute.xlu1 %v1455_v4  ;;  %1295 = vset.pattern.permute.xlu0 %v1455_v4  ;;  %v431_v6 = vld [vmem:[%s403_s17 + $0x8] sm:$0xff]  ;;  %v426_v7 = vld [vmem:[%s1558_s13] sm:$0xff]  ;;  %v428_v10 = vld [vmem:[%s1558_s13 + $0x10] sm:$0xff] }
  0x31   : > { %458 = vperm.xlu1 %1296, %v432_v2   ;;  %448 = vperm.xlu0 %1295, %v430_v3   ;;  %v427_v8 = vld [vmem:[%s1558_s13 + $0x8] sm:$0xff]  ;;  %v429_v12 = vld [vmem:[%s1558_s13 + $0x18] sm:$0xff]  ;;  %v434_v19 = vld [vmem:[#allocation2] sm:$0x1] }
  0x32   : > { %v435_v9 = vadd.f32 %v427_v8, %v426_v7  ;;  %v470_v46 = vld [vmem:[#allocation3 + $0x30] sm:$0xff]  ;;  %v471_v49 = vld [vmem:[#allocation3] sm:$0xff]  ;;  %v472_v52 = vld [vmem:[#allocation3 + $0x58] sm:$0xff] }
  0x33   : > { %v473_v55 = vld [vmem:[#allocation3 + $0x18] sm:$0xff]  ;;  %v474_v58 = vld [vmem:[#allocation3 + $0x50] sm:$0xff]  ;;  %v475_v61 = vld [vmem:[#allocation3 + $0x68] sm:$0xff] }
  0x34   : > { %v436_v11 = vadd.f32 %v435_v9, %v428_v10  ;;  %v476_v0 = vld [vmem:[#allocation3 + $0x8] sm:$0xff]  ;;  %v479_v9 = vld [vmem:[#allocation3 + $0x20] sm:$0xff] }
  0x35   : > { %v477_v3 = vld [vmem:[#allocation3 + $0x48] sm:$0xff] }
  0x36   : > { %v437_v13 = vadd.f32 %v436_v11, %v429_v12 }
  0x38   : > { %v438_v14 = vrot.slane %v437_v13, 4 }
  0x39   : > { %463 = vperm.xlu1 %1296, %v433_v5   ;;  %453 = vperm.xlu0 %1295, %v431_v6   ;;  %v478_v6 = vld [vmem:[#allocation3 + $0x40] sm:$0xff] }
  0x3a   : > { %v439_v15 = vadd.f32 %v438_v14, %v437_v13 }
  0x3c   : > { %v440_v16 = vrot.slane %v439_v15, 2 }
  0x3e   : > { %v441_v17 = vadd.f32 %v440_v16, %v439_v15  ;;  %v481_v15 = vld [vmem:[#allocation3 + $0x38] sm:$0xff] }
  0x40   : > { %v442_v18 = vrot.slane %v441_v17, 1 }
  0x42   : > { %v443_v20 = vadd.f32 %v442_v18, %v441_v17  ;;  %v482_v18 = vld [vmem:[#allocation3 + $0x60] sm:$0xff] }
  0x44   : > { %v444_v21 = vadd.f32 %v443_v20, %v434_v19 }
  0x46   : > { %445 = vst [vmem:[#allocation2] sm:$0x1] %v444_v21  ;;  %v483_v21 = vld [vmem:[#allocation3 + $0x70] sm:$0xff] }
  0xa3   : > { %v459_v22 = vpop.permute.xlu1 %458  ;;  %v449_v23 = vpop.permute.xlu0 %448 }
  0xa4   : > { %v466_v24 = vmul.f32 %v449_v23, %v426_v7  ;;  %v468_v27 = vmul.f32 %v459_v22, %v428_v10 }
  0xa6   : > { %486 = vxpose.xlu2.b32.start [1/4] (short) %v466_v24, 128 }
  0xab   : > { %v464_v25 = vpop.permute.xlu1 %463  ;;  %v454_v26 = vpop.permute.xlu0 %453 }
  0xac   : > { %v469_v28 = vmul.f32 %v464_v25, %v429_v12  ;;  %v467_v29 = vmul.f32 %v454_v26, %v427_v8  ;;  %v480_v12 = vld [vmem:[#allocation3 + $0x10] sm:$0xff] }
  0xae   : > { %579 = vmatpush.msra.mxu0 %v469_v28  ;;  %1213 = vmatpush.msra.mxu1 %v469_v28 }
  0xaf   : > { %1214 = vmatpush.msra.mxu2 %v469_v28  ;;  %1215 = vmatpush.msra.mxu3 %v469_v28 }
  0xb0   : > { %487 = vxpose.xlu2.b32.cont [2/4] (short) %v467_v29, 128  ;;  %580 = vmatpush.msra.mxu0 %v468_v27 }
  0xb1   : > { %1216 = vmatpush.msra.mxu1 %v468_v27  ;;  %1217 = vmatpush.msra.mxu2 %v468_v27 }
  0xb2   : > { %1218 = vmatpush.msra.mxu3 %v468_v27  ;;  %581 = vmatpush.msra.mxu0 %v467_v29 }
  0xb3   : > { %1219 = vmatpush.msra.mxu1 %v467_v29  ;;  %1220 = vmatpush.msra.mxu2 %v467_v29 }
  0xb4   : > { %1221 = vmatpush.msra.mxu3 %v467_v29  ;;  %582 = vmatpush.msra.mxu0 %v466_v24 }
  0xb5   : > { %1222 = vmatpush.msra.mxu1 %v466_v24  ;;  %1223 = vmatpush.msra.mxu2 %v466_v24 }
  0xb6   : > { %1224 = vmatpush.msra.mxu3 %v466_v24  ;;  %v484_v24 = vld [vmem:[#allocation3 + $0x78] sm:$0xff] }
  0xb8   : > { %488 = vxpose.xlu2.b32.cont [3/4] (short) %v468_v27, 128  ;;  %v485_v27 = vld [vmem:[#allocation3 + $0x28] sm:$0xff] }
  0xc0   : > { %489 = vxpose.xlu2.b32.end [4/4] (short) %v469_v28, 128 }
 0x141   : > { %v502_v30 = vpop.trf.xlu2 }
 0x142   : > { %1190 = vmatmul.msk.f32.vlgmr.msra.gmra.mxu0 %vm518_vm0, %v502_v30 }
 0x149   : > { %v503_v31 = vpop.trf.xlu2 }
 0x14a   : > { %1191 = vmatmul.msk.f32.gmra.mxu0 %vm518_vm0, %v503_v31 }
 0x151   : > { %v504_v32 = vpop.trf.xlu2 }
 0x152   : > { %1192 = vmatmul.msk.f32.gmra.mxu0 %vm518_vm0, %v504_v32 }
 0x159   : > { %v505_v33 = vpop.trf.xlu2 }
 0x15a   : > { %1193 = vmatmul.msk.f32.gmra.mxu0 %vm518_vm0, %v505_v33 }
 0x161   : > { %v506_v34 = vpop.trf.xlu2 }
 0x162   : > { %1194 = vmatmul.msk.f32.vlgmr.msra.gmra.mxu1 %vm518_vm0, %v506_v34 }
 0x169   : > { %v507_v35 = vpop.trf.xlu2 }
 0x16a   : > { %1195 = vmatmul.msk.f32.gmra.mxu1 %vm518_vm0, %v507_v35 }
 0x171   : > { %v508_v36 = vpop.trf.xlu2 }
 0x172   : > { %1196 = vmatmul.msk.f32.gmra.mxu1 %vm518_vm0, %v508_v36 }
 0x179   : > { %v509_v37 = vpop.trf.xlu2 }
 0x17a   : > { %1197 = vmatmul.msk.f32.gmra.mxu1 %vm518_vm0, %v509_v37 }
 0x181   : > { %v510_v38 = vpop.trf.xlu2 }
 0x182   : > { %1198 = vmatmul.msk.f32.vlgmr.msra.gmra.mxu2 %vm518_vm0, %v510_v38 }
 0x189   : > { %v511_v39 = vpop.trf.xlu2 }
 0x18a   : > { %1199 = vmatmul.msk.f32.gmra.mxu2 %vm518_vm0, %v511_v39 }
 0x191   : > { %v512_v40 = vpop.trf.xlu2 }
 0x192   : > { %1200 = vmatmul.msk.f32.gmra.mxu2 %vm518_vm0, %v512_v40 }
 0x199   : > { %v513_v41 = vpop.trf.xlu2 }
 0x19a   : > { %1201 = vmatmul.msk.f32.gmra.mxu2 %vm518_vm0, %v513_v41 }
 0x1a1   : > { %v514_v42 = vpop.trf.xlu2 }
 0x1a2   : > { %1202 = vmatmul.msk.f32.vlgmr.msra.gmra.mxu3 %vm518_vm0, %v514_v42 }
 0x1a9   : > { %v515_v43 = vpop.trf.xlu2 }
 0x1aa   : > { %1203 = vmatmul.msk.f32.gmra.mxu3 %vm518_vm0, %v515_v43 }
 0x1b1   : > { %v516_v44 = vpop.trf.xlu2 }
 0x1b2   : > { %1204 = vmatmul.msk.f32.gmra.mxu3 %vm518_vm0, %v516_v44 }
 0x1b9   : > { %v517_v45 = vpop.trf.xlu2 }
 0x1ba   : > { %1205 = vmatmul.msk.f32.gmra.mxu3 %vm518_vm0, %v517_v45 }
 0x1bf   : > { %v584_v47 = vpop.f32.mrf.mxu0 }
 0x1c0   : > { %v632_v48 = vadd.f32 %v584_v47, %v470_v46 }
 0x1c2   : > { %648 = vst [vmem:[#allocation3 + $0x30] sm:$0xff] %v632_v48 }
 0x1c7   : > { %v587_v50 = vpop.f32.mrf.mxu0 }
 0x1c8   : > { %v633_v51 = vadd.f32 %v587_v50, %v471_v49 }
 0x1ca   : > { %649 = vst [vmem:[#allocation3] sm:$0xff] %v633_v51 }
 0x1cf   : > { %v590_v53 = vpop.f32.mrf.mxu0 }
 0x1d0   : > { %v634_v54 = vadd.f32 %v590_v53, %v472_v52 }
 0x1d2   : > { %650 = vst [vmem:[#allocation3 + $0x58] sm:$0xff] %v634_v54 }
 0x1d7   : > { %v593_v56 = vpop.f32.mrf.mxu0 }
 0x1d8   : > { %v635_v57 = vadd.f32 %v593_v56, %v473_v55 }
 0x1da   : > { %651 = vst [vmem:[#allocation3 + $0x18] sm:$0xff] %v635_v57 }
 0x1df   : > { %v596_v59 = vpop.f32.mrf.mxu1 }
 0x1e0   : > { %v636_v60 = vadd.f32 %v596_v59, %v474_v58 }
 0x1e2   : > { %652 = vst [vmem:[#allocation3 + $0x50] sm:$0xff] %v636_v60 }
 0x1e7   : > { %v599_v62 = vpop.f32.mrf.mxu1 }
 0x1e8   : > { %v637_v63 = vadd.f32 %v599_v62, %v475_v61 }
 0x1ea   : > { %653 = vst [vmem:[#allocation3 + $0x68] sm:$0xff] %v637_v63 }
 0x1ef   : > { %v602_v1 = vpop.f32.mrf.mxu1 }
 0x1f0   : > { %v638_v2 = vadd.f32 %v602_v1, %v476_v0 }
 0x1f2   : > { %654 = vst [vmem:[#allocation3 + $0x8] sm:$0xff] %v638_v2 }
 0x1f7   : > { %v605_v4 = vpop.f32.mrf.mxu1 }
 0x1f8   : > { %v639_v5 = vadd.f32 %v605_v4, %v477_v3 }
 0x1fa   : > { %655 = vst [vmem:[#allocation3 + $0x48] sm:$0xff] %v639_v5 }
 0x205   : > { %v608_v7 = vpop.f32.mrf.mxu2 }
 0x206   : > { %v640_v8 = vadd.f32 %v608_v7, %v478_v6 }
 0x208   : > { %656 = vst [vmem:[#allocation3 + $0x40] sm:$0xff] %v640_v8 }
 0x20d   : > { %v611_v10 = vpop.f32.mrf.mxu2 }
 0x20e   : > { %v641_v11 = vadd.f32 %v611_v10, %v479_v9 }
 0x210   : > { %657 = vst [vmem:[#allocation3 + $0x20] sm:$0xff] %v641_v11 }
 0x215   : > { %v614_v13 = vpop.f32.mrf.mxu2 }
 0x216   : > { %v642_v14 = vadd.f32 %v614_v13, %v480_v12 }
 0x218   : > { %658 = vst [vmem:[#allocation3 + $0x10] sm:$0xff] %v642_v14 }
 0x21d   : > { %v617_v16 = vpop.f32.mrf.mxu2 }
 0x21e   : > { %v643_v17 = vadd.f32 %v617_v16, %v481_v15 }
 0x220   : > { %659 = vst [vmem:[#allocation3 + $0x38] sm:$0xff] %v643_v17 }
 0x225   : > { %v620_v19 = vpop.f32.mrf.mxu3 }
 0x226   : > { %v644_v20 = vadd.f32 %v620_v19, %v482_v18 }
 0x228   : > { %660 = vst [vmem:[#allocation3 + $0x60] sm:$0xff] %v644_v20 }
 0x22d   : > { %v623_v22 = vpop.f32.mrf.mxu3 }
 0x22e   : > { %v645_v23 = vadd.f32 %v623_v22, %v483_v21 }
 0x230   : > { %661 = vst [vmem:[#allocation3 + $0x70] sm:$0xff] %v645_v23 }
 0x235   : > { %v626_v25 = vpop.f32.mrf.mxu3 }
 0x236   : > { %v646_v26 = vadd.f32 %v626_v25, %v484_v24 }
 0x238   : > { %662 = vst [vmem:[#allocation3 + $0x78] sm:$0xff] %v646_v26 }
 0x23c   : > { %667 = sbr.rel (%p1206_p8) target bundleno = 1665 (0x681), region = 72 }
 0x23d   : > { %v629_v28 = vpop.f32.mrf.mxu3 }
 0x23e   : > { %v647_v29 = vadd.f32 %v629_v28, %v485_v27 }
 0x240   : > { %663 = vst [vmem:[#allocation3 + $0x28] sm:$0xff] %v647_v29 }
 0x241   : > { %v668_v30 = vld [vmem:[#allocation4] sm:$0x1]  ;;  %v691_v32 = vld [vmem:[#allocation5 + $0x70] sm:$0xff]  ;;  %v1456_v33 = vmov 0   ;;  %v690_v34 = vld [vmem:[#allocation5 + $0x68] sm:$0xff]  ;;  %v835_v46 = vlaneseq }
 0x242   : > { %v692_v31 = vld [vmem:[#allocation5 + $0x78] sm:$0xff]  ;;  %1297 = vset.pattern.permute.xlu0 %v1456_v33  ;;  %v689_v35 = vld [vmem:[#allocation5 + $0x60] sm:$0xff]  ;;  %v687_v37 = vld [vmem:[#allocation5 + $0x50] sm:$0xff] }
 0x243   : > { %694 = vmatpush.msra.mxu0 %v692_v31  ;;  %672 = vperm.xlu0 %1297, %v668_v30   ;;  %v688_v36 = vld [vmem:[#allocation5 + $0x58] sm:$0xff]  ;;  %v686_v38 = vld [vmem:[#allocation5 + $0x48] sm:$0xff]  ;;  %v685_v39 = vld [vmem:[#allocation5 + $0x40] sm:$0xff]  ;;  %v1586_v47 = vshrl.u32 %v835_v46, 7  ;;  %v1589_v49 = vand.u32 127, %v835_v46 }
 0x244   : > { %v684_v40 = vld [vmem:[#allocation5 + $0x38] sm:$0xff]  ;;  %v683_v41 = vld [vmem:[#allocation5 + $0x30] sm:$0xff]  ;;  %v682_v42 = vld [vmem:[#allocation5 + $0x28] sm:$0xff] }
 0x245   : > { %695 = vmatpush.msra.mxu0 %v691_v32  ;;  %v681_v43 = vld [vmem:[#allocation5 + $0x20] sm:$0xff]  ;;  %v680_v44 = vld [vmem:[#allocation5 + $0x18] sm:$0xff]  ;;  %v679_v45 = vld [vmem:[#allocation5 + $0x10] sm:$0xff]  ;;  %v837_v48 = vadd.s32 8, %v1586_v47  ;;  %v838_v52 = vadd.s32 16, %v1586_v47  ;;  %vm854_vm1 = vcmp.eq.s32.totalorder %v1586_v47, %v1589_v49  ;;  %v839_v56 = vadd.s32 24, %v1586_v47 }
 0x246   : > { %v1591_v50 = vld [vmem:[#allocation3 + $0x30] sm:$0xff]  ;;  %v1593_v51 = vld [vmem:[#allocation3] sm:$0xff]  ;;  %v1601_v55 = vld [vmem:[#allocation3 + $0x58] sm:$0xff]  ;;  %v840_v60 = vadd.s32 32, %v1586_v47  ;;  %v841_v0 = vadd.s32 40, %v1586_v47  ;;  %v842_v4 = vadd.s32 48, %v1586_v47 }
 0x247   : > { %696 = vmatpush.msra.mxu0 %v690_v34  ;;  %vm855_vm2 = vcmp.eq.s32.totalorder %v837_v48, %v1589_v49  ;;  %v870_v53 = vsel %vm854_vm1, %v1591_v50, 0.0  ;;  %vm856_vm3 = vcmp.eq.s32.totalorder %v838_v52, %v1589_v49  ;;  %v1606_v59 = vld [vmem:[#allocation3 + $0x18] sm:$0xff]  ;;  %vm857_vm4 = vcmp.eq.s32.totalorder %v839_v56, %v1589_v49  ;;  %v1611_v63 = vld [vmem:[#allocation3 + $0x50] sm:$0xff]  ;;  %v1616_v3 = vld [vmem:[#allocation3 + $0x68] sm:$0xff] }
 0x248   : > { %v871_v54 = vsel %vm855_vm2, %v1593_v51, 0.0  ;;  %v872_v58 = vsel %vm856_vm3, %v1601_v55, 0.0  ;;  %v873_v62 = vsel %vm857_vm4, %v1606_v59, 0.0  ;;  %vm858_vm5 = vcmp.eq.s32.totalorder %v840_v60, %v1589_v49  ;;  %v1621_v7 = vld [vmem:[#allocation3 + $0x8] sm:$0xff]  ;;  %v1631_v15 = vld [vmem:[#allocation3 + $0x40] sm:$0xff]  ;;  %v1641_v23 = vld [vmem:[#allocation3 + $0x10] sm:$0xff] }
 0x249   : > { %697 = vmatpush.msra.mxu0 %v689_v35  ;;  %v886_v57 = vadd.f32 %v871_v54, %v870_v53  ;;  %v874_v2 = vsel %vm858_vm5, %v1611_v63, 0.0  ;;  %vm859_vm6 = vcmp.eq.s32.totalorder %v841_v0, %v1589_v49  ;;  %v843_v8 = vadd.s32 56, %v1586_v47  ;;  %v1626_v11 = vld [vmem:[#allocation3 + $0x48] sm:$0xff]  ;;  %v1636_v19 = vld [vmem:[#allocation3 + $0x20] sm:$0xff]  ;;  %v1646_v27 = vld [vmem:[#allocation3 + $0x38] sm:$0xff] }
 0x24a   : > { %v875_v6 = vsel %vm859_vm6, %v1616_v3, 0.0  ;;  %vm860_vm7 = vcmp.eq.s32.totalorder %v842_v4, %v1589_v49  ;;  %v844_v12 = vadd.s32 64, %v1586_v47  ;;  %v845_v16 = vadd.s32 72, %v1586_v47  ;;  %v1650_v29 = vld [vmem:[#allocation3 + $0x28] sm:$0xff]  ;;  %v1654_v32 = vld [vmem:[#allocation3 + $0x60] sm:$0xff]  ;;  %v1656_v33 = vld [vmem:[#allocation3 + $0x78] sm:$0xff] }
 0x24b   : > { %698 = vmatpush.msra.mxu0 %v688_v36  ;;  %v887_v61 = vadd.f32 %v886_v57, %v872_v58  ;;  %v876_v10 = vsel %vm860_vm7, %v1621_v7, 0.0  ;;  %vm861_vm8 = vcmp.eq.s32.totalorder %v843_v8, %v1589_v49  ;;  %v846_v20 = vadd.s32 80, %v1586_v47  ;;  %909 = vmatpush.msra.mxu2 %v1650_v29  ;;  %v1661_v35 = vld [vmem:[#allocation3 + $0x70] sm:$0xff]  ;;  %v669_v57 = vld [vmem:[#allocation2] sm:$0x1] }
 0x24c   : > { %v877_v14 = vsel %vm861_vm8, %v1626_v11, 0.0  ;;  %vm862_vm9 = vcmp.eq.s32.totalorder %v844_v12, %v1589_v49  ;;  %vm863_vm10 = vcmp.eq.s32.totalorder %v845_v16, %v1589_v49  ;;  %v847_v24 = vadd.s32 88, %v1586_v47  ;;  %v693_v4 = vld [vmem:[%s1774_s4] sm:$0x1] }
 0x24d   : > { %699 = vmatpush.msra.mxu0 %v687_v37  ;;  %v888_v1 = vadd.f32 %v887_v61, %v873_v62  ;;  %v878_v18 = vsel %vm862_vm9, %v1631_v15, 0.0  ;;  %v879_v22 = vsel %vm863_vm10, %v1636_v19, 0.0  ;;  %vm864_vm11 = vcmp.eq.s32.totalorder %v846_v20, %v1589_v49  ;;  %910 = vmatpush.msra.mxu2 %v1656_v33  ;;  %v764_v12 = vld [vmem:[#allocation8 + $0x78] sm:$0xff] }
 0x24e   : > { %v880_v26 = vsel %vm864_vm11, %v1641_v23, 0.0  ;;  %v848_v28 = vadd.s32 96, %v1586_v47  ;;  %vm865_vm12 = vcmp.eq.s32.totalorder %v847_v24, %v1589_v49  ;;  %v849_v34 = vadd.s32 104, %v1586_v47  ;;  %766 = vmatpush.msra.mxu1 %v764_v12 }
 0x24f   : > { %700 = vmatpush.msra.mxu0 %v686_v38  ;;  %v889_v5 = vadd.f32 %v888_v1, %v874_v2  ;;  %v881_v31 = vsel %vm865_vm12, %v1646_v27, 0.0  ;;  %911 = vmatpush.msra.mxu2 %v1661_v35  ;;  %v850_v38 = vadd.s32 112, %v1586_v47  ;;  %vm715_vm1 = vcmask 1040384  }
 0x250   : > { %vm866_vm13 = vcmp.eq.s32.totalorder %v848_v28, %v1589_v49  ;;  %vm867_vm14 = vcmp.eq.s32.totalorder %v849_v34, %v1589_v49  ;;  %v760_v34 = vld [vmem:[#allocation8 + $0x58] sm:$0xff] }
 0x251   : > { %701 = vmatpush.msra.mxu0 %v685_v39  ;;  %v890_v9 = vadd.f32 %v889_v5, %v875_v6  ;;  %v882_v37 = vsel %vm866_vm13, %v1654_v32, 0.0  ;;  %912 = vmatpush.msra.mxu2 %v1654_v32  ;;  %vm868_vm15 = vcmp.eq.s32.totalorder %v850_v38, %v1589_v49  ;;  %v757_v38 = vld [vmem:[#allocation8 + $0x40] sm:$0xff] }
 0x253   : > { %702 = vmatpush.msra.mxu0 %v684_v40  ;;  %v891_v13 = vadd.f32 %v890_v9, %v876_v10  ;;  %v883_v40 = vsel %vm867_vm14, %v1661_v35, 0.0  ;;  %913 = vmatpush.msra.mxu2 %v1646_v27  ;;  %v1457_v10 = vmov 128.0  }
 0x254   : > { %1298 = vrcp.f32 %v1457_v10 }
 0x255   : > { %703 = vmatpush.msra.mxu0 %v683_v41  ;;  %v892_v17 = vadd.f32 %v891_v13, %v877_v14  ;;  %v678_v41 = vld [vmem:[#allocation5 + $0x8] sm:$0xff]  ;;  %914 = vmatpush.msra.mxu2 %v1641_v23  ;;  %v763_v13 = vld [vmem:[#allocation8 + $0x70] sm:$0xff] }
 0x256   : > { %767 = vmatpush.msra.mxu1 %v763_v13 }
 0x257   : > { %704 = vmatpush.msra.mxu0 %v682_v42  ;;  %v893_v21 = vadd.f32 %v892_v17, %v878_v18  ;;  %v851_v42 = vadd.s32 120, %v1586_v47  ;;  %915 = vmatpush.msra.mxu2 %v1636_v19 }
 0x259   : > { %705 = vmatpush.msra.mxu0 %v681_v43  ;;  %v894_v25 = vadd.f32 %v893_v21, %v879_v22  ;;  %v677_v43 = vld [vmem:[#allocation5] sm:$0xff]  ;;  %vm869_vm0 = vcmp.eq.s32.totalorder %v851_v42, %v1589_v49  ;;  %916 = vmatpush.msra.mxu2 %v1631_v15 }
 0x25a   : > { %v885_v48 = vsel %vm869_vm0, %v1650_v29, 0.0  ;;  %v1299_v14 = vpop.eup %1298  ;;  %v753_v42 = vld [vmem:[#allocation8 + $0x20] sm:$0xff] }
 0x25b   : > { %706 = vmatpush.msra.mxu0 %v680_v44  ;;  %v895_v30 = vadd.f32 %v894_v25, %v880_v26  ;;  %917 = vmatpush.msra.mxu2 %v1626_v11  ;;  %v720_v16 = vmul.f32 128.0, %v1299_v14  ;;  %vm724_vm2 = vweird.f32 %v1299_v14 }
 0x25d   : > { %707 = vmatpush.msra.mxu0 %v679_v45  ;;  %v896_v36 = vadd.f32 %v895_v30, %v881_v31  ;;  %v884_v45 = vsel %vm868_vm15, %v1656_v33, 0.0  ;;  %918 = vmatpush.msra.mxu2 %v1621_v7  ;;  %v721_v17 = vsub.f32 1.0, %v720_v16  ;;  %v762_v30 = vld [vmem:[#allocation8 + $0x68] sm:$0xff]  ;;  %v761_v31 = vld [vmem:[#allocation8 + $0x60] sm:$0xff] }
 0x25e   : > { %768 = vmatpush.msra.mxu1 %v762_v30 }
 0x25f   : > { %v897_v39 = vadd.f32 %v896_v36, %v882_v37  ;;  %708 = vmatpush.msra.mxu0 %v678_v41  ;;  %919 = vmatpush.msra.mxu2 %v1616_v3  ;;  %v722_v18 = vmul.f32 %v1299_v14, %v721_v17  ;;  %v759_v36 = vld [vmem:[#allocation8 + $0x50] sm:$0xff]  ;;  %v758_v37 = vld [vmem:[#allocation8 + $0x48] sm:$0xff] }
 0x260   : > { %769 = vmatpush.msra.mxu1 %v761_v31  ;;  %v754_v41 = vld [vmem:[#allocation8 + $0x28] sm:$0xff] }
 0x261   : > { %v898_v44 = vadd.f32 %v897_v39, %v883_v40  ;;  %709 = vmatpush.msra.mxu0 %v677_v43  ;;  %920 = vmatpush.msra.mxu2 %v1611_v63  ;;  %v723_v20 = vadd.f32 %v1299_v14, %v722_v18  ;;  %v756_v39 = vld [vmem:[#allocation8 + $0x38] sm:$0xff]  ;;  %v755_v40 = vld [vmem:[#allocation8 + $0x30] sm:$0xff] }
 0x262   : > { %770 = vmatpush.msra.mxu1 %v760_v34  ;;  %v752_v43 = vld [vmem:[#allocation8 + $0x18] sm:$0xff] }
 0x263   : > { %v899_v46 = vadd.f32 %v898_v44, %v884_v45  ;;  %921 = vmatpush.msra.mxu2 %v1606_v59  ;;  %v1699_v21 = vsel %vm724_vm2, %v1299_v14, %v723_v20  ;;  %v751_v44 = vld [vmem:[#allocation8 + $0x10] sm:$0xff]  ;;  %v750_v45 = vld [vmem:[#allocation8 + $0x8] sm:$0xff]  ;;  %vm1069_vm2 = vcmask 0  }
 0x264   : > { %771 = vmatpush.msra.mxu1 %v759_v36 }
 0x265   : > { %v900_v47 = vadd.f32 %v899_v46, %v885_v48  ;;  %922 = vmatpush.msra.mxu2 %v1601_v55  ;;  %v749_v46 = vld [vmem:[#allocation8] sm:$0xff] }
 0x266   : > { %772 = vmatpush.msra.mxu1 %v758_v37 }
 0x267   : > { %v901_v52 = vrot.slane %v900_v47, 4  ;;  %923 = vmatpush.msra.mxu2 %v1593_v51 }
 0x268   : > { %773 = vmatpush.msra.mxu1 %v757_v38 }
 0x269   : > { %v902_v49 = vadd.f32 %v901_v52, %v900_v47  ;;  %924 = vmatpush.msra.mxu2 %v1591_v50 }
 0x26a   : > { %774 = vmatpush.msra.mxu1 %v756_v39 }
 0x26b   : > { %v903_v53 = vrot.slane %v902_v49, 2 }
 0x26c   : > { %775 = vmatpush.msra.mxu1 %v755_v40 }
 0x26d   : > { %v904_v54 = vadd.f32 %v903_v53, %v902_v49 }
 0x26e   : > { %776 = vmatpush.msra.mxu1 %v754_v41 }
 0x26f   : > { %v905_v56 = vrot.slane %v904_v54, 1 }
 0x270   : > { %777 = vmatpush.msra.mxu1 %v753_v42 }
 0x271   : > { %v906_v62 = vadd.f32 %v905_v56, %v904_v54 }
 0x272   : > { %778 = vmatpush.msra.mxu1 %v752_v43  ;;  %v975_v43 = vadd.f32 %v1593_v51, %v1591_v50 }
 0x274   : > { %779 = vmatpush.msra.mxu1 %v751_v44  ;;  %v976_v44 = vadd.f32 %v975_v43, %v1601_v55 }
 0x276   : > { %780 = vmatpush.msra.mxu1 %v750_v45  ;;  %v977_v45 = vadd.f32 %v976_v44, %v1606_v59 }
 0x278   : > { %781 = vmatpush.msra.mxu1 %v749_v46  ;;  %v978_v46 = vadd.f32 %v977_v45, %v1611_v63 }
 0x2b5   : > { %v673_v58 = vpop.permute.xlu0 %672 }
 0x2b6   : > { %v675_v60 = vperm.slane %v673_v58, 0 }
 0x2b8   : > { %v1686_v61 = vmul.f32 %v675_v60, %v669_v57 }
 0x2ba   : > { %710 = vmatmul.f32.vlgmr.msra.gmra.mxu0 %v1686_v61  ;;  %v907_v0 = vmul.f32 %v1686_v61, %v1686_v61 }
 0x2bc   : > { %v1691_v1 = vsub.f32 %v906_v62, %v907_v0  ;;  %v745_v62 = vld [vmem:[%s1775_s5] sm:$0x1] }
 0x2be   : > { %v965_v2 = vsel %vm715_vm1, %v1691_v1, 0.0 }
 0x2bf   : > { %966 = vadd.xlane.f32.xlu2 %v965_v2  ;;  %v747_v2 = vld [vmem:[%s1776_s6] sm:$0x1] }
 0x337   : > { %v711_v5 = vpop.f32.mrf.mxu0 }
 0x338   : > { %v712_v6 = vadd.f32 %v711_v5, %v693_v4 }
 0x33a   : > { %v714_v8 = vmax.f32 %v712_v6, 0.0  ;;  %v765_v6 = vld [vmem:[%s1778_s8] sm:$0x1] }
 0x33c   : > { %v716_v9 = vsel %vm715_vm1, %v714_v8, 0.0 }
 0x33d   : > { %717 = vadd.xlane.f32.xlu0 %v716_v9 }
 0x3b0   : > { %v718_v22 = vpop.xlane.xlu0 %717 }
 0x3b1   : > { %v726_v24 = vmul.f32 %v1699_v21, %v718_v22 }
 0x3b3   : > { %v727_v25 = vsub.f32 %v714_v8, %v726_v24 }
 0x3b5   : > { %v728_v26 = vmul.f32 %v727_v25, %v727_v25 }
 0x3b7   : > { %v729_v28 = vsel %vm715_vm1, %v728_v26, 0.0 }
 0x3b8   : > { %730 = vadd.xlane.f32.xlu1 %v729_v28 }
 0x42b   : > { %v731_v48 = vpop.xlane.xlu1 %730 }
 0x42c   : > { %v732_v47 = vmul.f32 %v731_v48, %v1699_v21  ;;  %v979_v48 = vadd.f32 %v978_v46, %v1616_v3 }
 0x42e   : > { %v733_v52 = vadd.f32 1e-05, %v732_v47  ;;  %v980_v47 = vadd.f32 %v979_v48, %v1621_v7 }
 0x430   : > { %1300 = vrsqrt.f32 %v733_v52  ;;  %vm740_vm4 = vweird.f32 %v733_v52 }
 0x436   : > { %v1301_v49 = vpop.eup %1300 }
 0x437   : > { %v735_v53 = vmul.f32 %v1301_v49, %v733_v52  ;;  %vm741_vm3 = vweird.f32 %v1301_v49 }
 0x438   : > { %vm742_vm5 = vmor %vm740_vm4, %vm741_vm3 }
 0x439   : > { %v736_v54 = vmul.f32 %v1301_v49, %v735_v53 }
 0x43b   : > { %v737_v56 = vmul.f32 0.5, %v736_v54 }
 0x43d   : > { %v738_v57 = vsub.f32 1.5, %v737_v56 }
 0x43f   : > { %v739_v58 = vmul.f32 %v1301_v49, %v738_v57 }
 0x441   : > { %v743_v60 = vsel %vm742_vm5, %v1301_v49, %v739_v58 }
 0x442   : > { %v744_v0 = vmul.f32 %v743_v60, %v727_v25 }
 0x444   : > { %v746_v4 = vmul.f32 %v745_v62, %v744_v0 }
 0x446   : > { %v748_v5 = vadd.f32 %v747_v2, %v746_v4 }
 0x448   : > { %782 = vmatmul.f32.vlgmr.msra.gmra.mxu1 %v748_v5 }
 0x4c5   : > { %v783_v8 = vpop.f32.mrf.mxu1 }
 0x4c6   : > { %v784_v9 = vadd.f32 %v783_v8, %v765_v6 }
 0x4c8   : > { %v786_v10 = vsub.f32 0.0, %v784_v9 }
 0x4ca   : > { %v787_v12 = vmul.f32 1.442695, %v786_v10 }
 0x4cc   : > { %1302 = vpow2.f32 %v787_v12 }
 0x4d2   : > { %v1303_v13 = vpop.eup %1302 }
 0x4d3   : > { %v789_v14 = vadd.f32 1.0, %v1303_v13 }
 0x4d5   : > { %1304 = vrcp.f32 %v789_v14  ;;  %v801_v20 = vand.u32 2147483648, %v789_v14  ;;  %v799_v24 = vand.u32 2147483647, %v789_v14  ;;  %vm795_vm7 = vweird.f32 %v789_v14 }
 0x4d7   : > { %v802_v26 = vor.u32 1.1754944e-38, %v801_v20  ;;  %vm800_vm9 = vcmp.eq.f32.partialorder %v799_v24, 8.507059e+37 }
 0x4db   : > { %v1305_v16 = vpop.eup %1304 }
 0x4dc   : > { %v791_v17 = vmul.f32 %v1305_v16, %v789_v14  ;;  %vm796_vm6 = vweird.f32 %v1305_v16 }
 0x4dd   : > { %vm797_vm8 = vmor %vm795_vm7, %vm796_vm6 }
 0x4de   : > { %v792_v18 = vsub.f32 1.0, %v791_v17 }
 0x4e0   : > { %v793_v22 = vmul.f32 %v1305_v16, %v792_v18 }
 0x4e2   : > { %v794_v25 = vadd.f32 %v1305_v16, %v793_v22 }
 0x4e4   : > { %v798_v28 = vsel %vm797_vm8, %v1305_v16, %v794_v25 }
 0x4e5   : > { %v803_v30 = vsel %vm800_vm9, %v802_v26, %v798_v28 }
 0x4e6   : > { %v805_v31 = vmul.f32 2.0, %v803_v30 }
 0x4e8   : > { %v806_v34 = vadd.f32 0.25, %v805_v31 }
 0x4ea   : > { %807 = vst [vmem:[#allocation10] sm:$0x1] %v806_v34  ;;  %925 = vmatmul.f32.vlgmr.msra.gmra.mxu2 %v806_v34  ;;  %v940_v36 = vmul.f32 %v806_v34, %v1686_v61  ;;  %v824_v37 = vmul.f32 %v806_v34, %v806_v34  ;;  %v953_v40 = vmul.f32 %v1691_v1, %v806_v34 }
 0x4eb   : > { %v981_v1 = vadd.f32 %v980_v47, %v1626_v11 }
 0x4ec   : > { %v941_v38 = vsel %vm715_vm1, %v940_v36, 0.0  ;;  %v825_v39 = vsel %vm715_vm1, %v824_v37, 0.0  ;;  %v954_v41 = vmul.f32 %v953_v40, %v806_v34 }
 0x4ed   : > { %942 = vadd.xlane.f32.xlu2 %v941_v38  ;;  %826 = vadd.xlane.f32.xlu1 %v825_v39  ;;  %v982_v52 = vadd.f32 %v981_v1, %v1631_v15 }
 0x4ee   : > { %v955_v42 = vsel %vm715_vm1, %v954_v41, 0.0 }
 0x4ef   : > { %v983_v49 = vadd.f32 %v982_v52, %v1636_v19 }
 0x4f1   : > { %v984_v53 = vadd.f32 %v983_v49, %v1641_v23 }
 0x4f3   : > { %v985_v50 = vadd.f32 %v984_v53, %v1646_v27 }
 0x4f5   : > { %956 = vadd.xlane.f32.xlu1 %v955_v42  ;;  %v986_v51 = vadd.f32 %v985_v50, %v1654_v32  ;;  %v999_v32 = vsel %vm715_vm1, %v1686_v61, 0.0 }
 0x4f7   : > { %v987_v55 = vadd.f32 %v986_v51, %v1661_v35 }
 0x4f9   : > { %v988_v59 = vadd.f32 %v987_v55, %v1656_v33  ;;  %v967_v33 = vpop.xlane.xlu2 %966 }
 0x4fa   : > { %v968_v2 = vrot.slane %v967_v33, 4 }
 0x4fb   : > { %v989_v63 = vadd.f32 %v988_v59, %v1650_v29 }
 0x4fc   : > { %v969_v8 = vadd.f32 %v968_v2, %v967_v33 }
 0x4fd   : > { %990 = vadd.xlane.f32.xlu1 %v989_v63 }
 0x4fe   : > { %v970_v16 = vrot.slane %v969_v8, 2 }
 0x500   : > { %v971_v24 = vadd.f32 %v970_v16, %v969_v8 }
 0x502   : > { %v972_v37 = vrot.slane %v971_v24, 1 }
 0x504   : > { %v973_v44 = vadd.f32 %v972_v37, %v971_v24 }
 0x560   : > { %v827_v3 = vpop.xlane.xlu1 %826  ;;  %v943_v35 = vpop.xlane.xlu2 %942 }
 0x561   : > { %v828_v7 = vrot.slane %v827_v3, 4  ;;  %v944_v60 = vrot.slane %v943_v35, 4 }
 0x563   : > { %v829_v11 = vadd.f32 %v828_v7, %v827_v3  ;;  %v945_v4 = vadd.f32 %v944_v60, %v943_v35 }
 0x565   : > { %v830_v54 = vrot.slane %v829_v11, 2  ;;  %v946_v9 = vrot.slane %v945_v4, 2 }
 0x567   : > { %v831_v15 = vadd.f32 %v830_v54, %v829_v11  ;;  %v947_v17 = vadd.f32 %v946_v9, %v945_v4 }
 0x568   : > { %v957_v29 = vpop.xlane.xlu1 %956 }
 0x569   : > { %v832_v56 = vrot.slane %v831_v15, 1  ;;  %v958_v62 = vrot.slane %v957_v29, 4  ;;  %v948_v28 = vrot.slane %v947_v17, 1 }
 0x56b   : > { %v833_v19 = vadd.f32 %v832_v56, %v831_v15  ;;  %v959_v5 = vadd.f32 %v958_v62, %v957_v29  ;;  %v949_v40 = vadd.f32 %v948_v28, %v947_v17 }
 0x56d   : > { %1225 = vpush %v833_v19  ;;  %v926_v23 = vpop.f32.mrf.mxu2  ;;  %v960_v12 = vrot.slane %v959_v5, 2 }
 0x56e   : > { %v929_v57 = vmul.f32 %v926_v23, %v806_v34 }
 0x56f   : > { %v961_v22 = vadd.f32 %v960_v12, %v959_v5 }
 0x570   : > { %v930_v27 = vsel %vm715_vm1, %v929_v57, 0.0  ;;  %v991_v58 = vpop.xlane.xlu1 %990 }
 0x571   : > { %931 = vadd.xlane.f32.xlu2 %v930_v27  ;;  %v992_v0 = vrot.slane %v991_v58, 4  ;;  %v962_v34 = vrot.slane %v961_v22, 1 }
 0x573   : > { %v993_v6 = vadd.f32 %v992_v0, %v991_v58  ;;  %v963_v42 = vadd.f32 %v962_v34, %v961_v22 }
 0x575   : > { %v994_v14 = vrot.slane %v993_v6, 2 }
 0x577   : > { %v995_v20 = vadd.f32 %v994_v14, %v993_v6 }
 0x579   : > { %1000 = vadd.xlane.f32.xlu2 %v999_v32  ;;  %v996_v36 = vrot.slane %v995_v20, 1 }
 0x57b   : > { %v997_v43 = vadd.f32 %v996_v36, %v995_v20 }
 0x59e   : > { %s1226_s26 = spop %1225 }
 0x59f   : > { %v1051_v47 = vstv %s1226_s26 }
 0x5a0   : > { %1306 = vrcp.f32 %v1051_v47  ;;  %v1063_v11 = vand.u32 2147483648, %v1051_v47  ;;  %vm1057_vm12 = vweird.f32 %v1051_v47  ;;  %v1061_v54 = vand.u32 2147483647, %v1051_v47 }
 0x5a2   : > { %v1064_v57 = vor.u32 1.1754944e-38, %v1063_v11  ;;  %vm1062_vm1 = vcmp.eq.f32.partialorder %v1061_v54, 8.507059e+37 }
 0x5e4   : > { %v932_v10 = vpop.xlane.xlu2 %931 }
 0x5e5   : > { %v933_v13 = vrot.slane %v932_v10, 4 }
 0x5e7   : > { %v934_v61 = vadd.f32 %v933_v13, %v932_v10 }
 0x5e9   : > { %v935_v18 = vrot.slane %v934_v61, 2 }
 0x5eb   : > { %v936_v25 = vadd.f32 %v935_v18, %v934_v61 }
 0x5ec   : > { %v1001_v26 = vpop.xlane.xlu2 %1000 }
 0x5ed   : > { %v1002_v30 = vrot.slane %v1001_v26, 4  ;;  %v937_v31 = vrot.slane %v936_v25, 1 }
 0x5ef   : > { %v1003_v38 = vadd.f32 %v1002_v30, %v1001_v26  ;;  %v938_v39 = vadd.f32 %v937_v31, %v936_v25 }
 0x5f1   : > { %v1004_v41 = vrot.slane %v1003_v38, 2  ;;  %1227 = vpush %v938_v39 }
 0x5f2   : > { %1229 = vpush %v949_v40 }
 0x5f3   : > { %v1005_v45 = vadd.f32 %v1004_v41, %v1003_v38  ;;  %1231 = vpush %v963_v42 }
 0x5f4   : > { %1233 = vpush %v973_v44 }
 0x5f5   : > { %1235 = vpush %v997_v43  ;;  %v1006_v46 = vrot.slane %v1005_v45, 1 }
 0x5f7   : > { %v1007_v48 = vadd.f32 %v1006_v46, %v1005_v45 }
 0x5f9   : > { %1237 = vpush %v1007_v48 }
 0x5fa   : > { %1239 = vpush %v1699_v21  ;;  %v1307_v21 = vpop.eup %1306 }
 0x5fb   : > { %v1053_v1 = vmul.f32 %v1307_v21, %v1051_v47  ;;  %vm1058_vm10 = vweird.f32 %v1307_v21 }
 0x5fc   : > { %vm1059_vm14 = vmor %vm1057_vm12, %vm1058_vm10 }
 0x5fd   : > { %v1054_v49 = vsub.f32 1.0, %v1053_v1 }
 0x5ff   : > { %v1055_v50 = vmul.f32 %v1307_v21, %v1054_v49 }
 0x601   : > { %v1056_v63 = vadd.f32 %v1307_v21, %v1055_v50 }
 0x603   : > { %v1060_v19 = vsel %vm1059_vm14, %v1307_v21, %v1056_v63 }
 0x604   : > { %v1065_v32 = vsel %vm1062_vm1, %v1064_v57, %v1060_v19 }
 0x622   : > { %s1228_s27 = spop %1227 }
 0x623   : > { %s1230_s28 = spop %1229 }
 0x624   : > { %s951_s29 = smul.f32 %s1230_s28, %s1230_s28  ;;  %s1738_s11 = spop %1231 }
 0x625   : > { %s1234_s13 = spop %1233 }
 0x626   : > { %s952_s30 = ssub.f32 %s1228_s27, %s951_s29  ;;  %s1236_s14 = spop %1235 }
 0x628   : > { %s1011_s12 = ssub.f32 %s952_s30, %s1738_s11 }
 0x62a   : > { %s1238_s16 = spop %1237 }
 0x62b   : > { %s1009_s17 = smul.f32 %s1238_s16, %s1238_s16  ;;  %s1240_s18 = spop %1239 }
 0x62c   : > { %s1741_s19 = smul.f32 %s1240_s18, %s1011_s12 }
 0x62d   : > { %s1010_s20 = ssub.f32 %s1236_s14, %s1009_s17 }
 0x62e   : > { %s1021_s21 = ssub.f32 %s1738_s11, %s1741_s19 }
 0x62f   : > { %s1022_s22 = ssub.f32 %s1010_s20, %s1234_s13 }
 0x631   : > { %s1031_s23 = smul.f32 %s1240_s18, %s1022_s22 }
 0x633   : > { %s1032_s24 = ssub.f32 %s1234_s13, %s1031_s23 }
 0x635   : > { %v1033_v52 = vstv %s1032_s24 }
 0x636   : > { %1308 = vrcp.f32 %v1033_v52  ;;  %v1045_v59 = vand.u32 2147483648, %v1033_v52  ;;  %v1043_v7 = vand.u32 2147483647, %v1033_v52  ;;  %vm1039_vm13 = vweird.f32 %v1033_v52 }
 0x638   : > { %v1046_v56 = vor.u32 1.1754944e-38, %v1045_v59  ;;  %vm1044_vm0 = vcmp.eq.f32.partialorder %v1043_v7, 8.507059e+37 }
 0x63c   : > { %v1309_v53 = vpop.eup %1308 }
 0x63d   : > { %v1035_v51 = vmul.f32 %v1309_v53, %v1033_v52  ;;  %vm1040_vm11 = vweird.f32 %v1309_v53 }
 0x63e   : > { %vm1041_vm15 = vmor %vm1039_vm13, %vm1040_vm11 }
 0x63f   : > { %v1036_v55 = vsub.f32 1.0, %v1035_v51 }
 0x641   : > { %v1037_v3 = vmul.f32 %v1309_v53, %v1036_v55 }
 0x643   : > { %v1038_v15 = vadd.f32 %v1309_v53, %v1037_v3 }
 0x645   : > { %v1042_v23 = vsel %vm1041_vm15, %v1309_v53, %v1038_v15 }
 0x646   : > { %v1047_v27 = vsel %vm1044_vm0, %v1046_v56, %v1042_v23 }
 0x647   : > { %1241 = vpush %v1047_v27 }
 0x648   : > { %1243 = vpush %v1065_v32 }
 0x678   : > { %s1242_s25 = spop %1241 }
 0x679   : > { %s1049_s26 = smul.f32 %s1242_s25, %s1021_s21  ;;  %s1244_s28 = spop %1243 }
 0x67b   : > { %s1050_s27 = smul.f32 128.0, %s1049_s26 }
 0x67d   : > { %s1067_s29 = smul.f32 %s1244_s28, %s1050_s27 }
 0x67f   : > { %v1068_v33 = vstv %s1067_s29 }
 0x680   : > { %1070 = vst.msk [vmem:[#allocation11] sm:$0x1] %vm1069_vm2, %v1068_v33 }
 0x681 PF: > { %p1272_p9 = scmp.eq.s32.totalorder %s1527_s2, 3  ;;  %s1458_s30 = smov [#allocation10]  }
 0x682   : > { %s1077_s12 = sshll.u32 %s1458_s30, 4  ;;  %s1079_s16 = sshll.u32 %s1779_s9, 4  ;;  %s1078_s12 = int_to_ptr.vmem [resolvable:$true] %s1077_s12  ;;  %s1080_s16 = int_to_ptr.hbm [resolvable:$true] %s1079_s16 }
 0x683   : > { %1254 = dma.vmem_to_hbm [thread:$0]  (%p1272_p9), %s1078_s12, 16, %s1080_s16, [#allocation7]  }
 0x684   : > { %s1091_s18 = sshll.u32 %s1780_s10, 4  ;;  %s1459_s19 = smov [#allocation11]   ;;  %s1092_s18 = int_to_ptr.hbm [resolvable:$true] %s1091_s18 }
 0x685   : > { %s1089_s20 = sshll.u32 %s1459_s19, 4  ;;  %s1090_s20 = int_to_ptr.vmem [resolvable:$true] %s1089_s20 }
 0x686   : > { %1256 = dma.vmem_to_hbm [thread:$0]  (%p1272_p9), %s1090_s20, 16, %s1092_s18, [#allocation12]  }
 0x687   : > { %1439 = dma.done.wait (%p1272_p9), [#allocation7], 16  }
 0x688   : > { %1441 = vsyncadd (%p1272_p9), [#allocation7], 4294967280 }
 0x689   : > { %1443 = dma.done.wait (%p1272_p9), [#allocation12], 16  }
 0x68a   : > { %1445 = vsyncadd (%p1272_p9), [#allocation12], 4294967280 }
 0x68b PF: > { %s27_s15 = sadd.s32 1, %s1448_s15  }
 0x68c   : > { %p24_p10 = scmp.ge.s32.totalorder %s27_s15, 6  }
 0x68e   :  { %26 = sbr.rel (!%p24_p10) target bundleno = 7 (0x7), region = 111 }
 0x693   :  { %1110 = vsyncpa [#allocation6], 1 }
 0x694   :  { %1112 = vsyncpa [#allocation6 + $0x1], 1 }
 0x695   :  { %1113 = vsyncpa [#allocation9], 1 }
 0x696   :  { %1114 = vsyncpa [#allocation7], 1 }
 0x697   :  { %1116 = vsyncpa [#allocation7 + $0x1], 1 }
 0x698   :  { %1117 = vsyncpa [#allocation12], 1 }

</bundles_post_ra>
